<compile_context>
chip_gen: v7x
topology: tpu7x:2x2x1
jax: 0.10.0
libtpu: 0.0.40
codegen_flags: <defaults>
</compile_context>

<pallas_src>
import numpy as np
import jax
import jax.numpy as jnp
from jax import lax
from jax.experimental import pallas as pl
from jax.experimental.pallas import tpu as pltpu

K = 3          # kernel_sizes[0]; only the high-frequency path is active with defaults
EPS = 1e-5     # BatchNorm1d eps


def _round_up(n, m):
    return ((n + m - 1) // m) * m


def _tree_sum(xs):
    """Pairwise tree reduction -> shallow add chain (ILP for the 4 VALU slots)."""
    xs = list(xs)
    while len(xs) > 1:
        nxt = [xs[i] + xs[i + 1] for i in range(0, len(xs) - 1, 2)]
        if len(xs) % 2:
            nxt.append(xs[-1])
        xs = nxt
    return xs[0]


def gcnn_kernel(c_ref,            # (3,)             SMEM  per-layer additive consts (BN folded)
                w1_ref,           # (Cin*K,)         SMEM  conv1 weights (BN scale folded)
                w2_ref,           # (K,)             SMEM
                w3_ref,           # (K,)             SMEM
                x_ref,            # (Cin, TB, L)     VMEM
                pw_ref,           # (L3, n_hidden)   VMEM  pool_matrix @ wm1 (fused)
                bm1_ref,          # (1, n_hidden)    VMEM
                wm2_ref,          # (n_hidden, out)  VMEM
                bm2_ref,          # (1, out)         VMEM
                o_ref):           # (TB, out)        VMEM
    Cin, TB, L = x_ref.shape
    L1 = L - (K - 1)
    L2 = L1 - (K - 1)
    L3 = L2 - (K - 1)

    # ---- layer 1: Conv1d(Cin->1, k=3, valid) + folded BN + ReLU --------------
    # All Cin*K tap products are independent; reduce with a tree (depth ~log2(12)).
    prods = []
    for ci in range(Cin):
        xc = x_ref[ci]                                        # (TB, L)
        for k in range(K):
            prods.append(w1_ref[ci * K + k] * xc[:, k:k + L1])
    h = jnp.maximum(_tree_sum(prods) + c_ref[0], 0.0)         # (TB, L1)

    # ---- layer 2: Conv1d(1->1) + folded BN + (Dropout=id at eval) + ReLU -----
    taps2 = [w2_ref[k] * h[:, k:k + L2] for k in range(K)]
    h2 = jnp.maximum(_tree_sum(taps2) + c_ref[1], 0.0)        # (TB, L2)

    # ---- layer 3 --------------------------------------------------------------
    taps3 = [w3_ref[k] * h2[:, k:k + L3] for k in range(K)]
    h3 = jnp.maximum(_tree_sum(taps3) + c_ref[2], 0.0)        # (TB, L3)

    # ---- fused AdaptiveAvgPool1d + Linear(hid, n_hidden) + ReLU ---------------
    z = jnp.dot(h3, pw_ref[...], preferred_element_type=jnp.float32) + bm1_ref[...]
    z = jnp.maximum(z, 0.0)

    # ---- Linear(n_hidden, out) ------------------------------------------------
    # TODO(synk): for very large B, emit a lane-dense output layout (out on sublanes,
    # batch on lanes) to avoid masked vst on a last-dim of 1.
    o_ref[...] = jnp.dot(z, wm2_ref[...], preferred_element_type=jnp.float32) + bm2_ref[...]


def adaptive_avg_pool1d_matrix(l_in, l_out):
    """Matrix P (l_in, l_out) reproducing torch.nn.AdaptiveAvgPool1d window boundaries."""
    m = np.zeros((l_in, l_out), np.float32)
    for j in range(l_out):
        s = (j * l_in) // l_out
        e = -((-(j + 1) * l_in) // l_out)   # ceil
        m[s:e, j] = 1.0 / (e - s)
    return jnp.asarray(m)


def gcnn_forward(x, params, hid_dim, *, block_b=128):
    """x: (B, Cin, L) float32. Returns (B, out_dim)."""
    B, Cin, L = x.shape
    receptive = 3 * (K - 1)
    assert L > receptive, f"input length {L} too short for 3 valid k={K} convs"
    L3 = L - receptive
    assert L3 >= hid_dim, f"conv output length {L3} < adaptive-pool size {hid_dim}"

    n_hidden = params['wm1'].shape[1]
    out_dim = params['wm2'].shape[1]

    # Batch tile: multiple of 8 (full sublane occupancy), capped by block_b.
    TB = min(_round_up(block_b, 8), _round_up(B, 8))
    B_pad = _round_up(B, TB)
    if B_pad != B:
        x = jnp.pad(x, ((0, B_pad - B), (0, 0), (0, 0)))
    x_cbl = jnp.transpose(x, (1, 0, 2)).astype(jnp.float32)        # (Cin, B_pad, L)

    # Fuse AdaptiveAvgPool with the first MLP layer: h3 @ (P @ wm1).
    pool_fused = adaptive_avg_pool1d_matrix(L3, hid_dim) @ params['wm1']   # (L3, n_hidden)

    L1, L2 = L - (K - 1), L - 2 * (K - 1)
    flops = 2 * B_pad * (Cin * K * L1 + K * L2 + K * L3
                         + L3 * n_hidden + n_hidden * out_dim)
    bytes_accessed = 4 * (x_cbl.size + pool_fused.size + n_hidden
                          + n_hidden * out_dim + out_dim + B_pad * out_dim
                          + Cin * K + 2 * K + 3)

    out = pl.pallas_call(
        gcnn_kernel,
        out_shape=jax.ShapeDtypeStruct((B_pad, out_dim), jnp.float32),
        grid_spec=pltpu.PrefetchScalarGridSpec(
            num_scalar_prefetch=4,                  # c, w1, w2, w3 -> SMEM
            grid=(B_pad // TB,),
            in_specs=[
                pl.BlockSpec((Cin, TB, L), lambda b, *_: (0, b, 0)),          # x
                pl.BlockSpec((L3, n_hidden), lambda b, *_: (0, 0)),           # pool @ wm1
                pl.BlockSpec((1, n_hidden), lambda b, *_: (0, 0)),            # bm1
                pl.BlockSpec((n_hidden, out_dim), lambda b, *_: (0, 0)),      # wm2
                pl.BlockSpec((1, out_dim), lambda b, *_: (0, 0)),             # bm2
            ],
            out_specs=pl.BlockSpec((TB, out_dim), lambda b, *_: (b, 0)),
        ),
        compiler_params=pltpu.CompilerParams(
            dimension_semantics=("parallel",),       # megacore-shard the batch grid
            vmem_limit_bytes=64 * 1024 * 1024,
        ),
        cost_estimate=pl.CostEstimate(flops=flops, transcendentals=0,
                                      bytes_accessed=bytes_accessed),
    )(params['c'], params['w1'], params['w2'], params['w3'],
      x_cbl, pool_fused, params['bm1'], params['wm2'], params['bm2'])

    return out[:B]


def init_params(key, input_dim, hid_dim=10, n_hidden=50, output_dim=1):
    """Deterministic synthetic parameters matching the module's shapes (eval mode),
    plus host-side BN folding for the kernel."""
    ks = jax.random.split(key, 22)

    def conv(kw, kb, cin):
        w = jax.random.normal(kw, (1, cin, K), jnp.float32) * 0.2
        b = jax.random.normal(kb, (1,), jnp.float32) * 0.1
        return w, b

    w1, b1 = conv(ks[0], ks[1], input_dim)
    w2, b2 = conv(ks[2], ks[3], 1)
    w3, b3 = conv(ks[4], ks[5], 1)

    def bn(kg, kb, km, kv):
        g = 1.0 + 0.1 * jax.random.normal(kg, (1,), jnp.float32)
        be = 0.1 * jax.random.normal(kb, (1,), jnp.float32)
        m = 0.1 * jax.random.normal(km, (1,), jnp.float32)
        v = jax.random.uniform(kv, (1,), jnp.float32, minval=0.5, maxval=1.5)
        return g, be, m, v

    g1, be1, m1, v1 = bn(ks[6], ks[7], ks[8], ks[9])
    g2, be2, m2, v2 = bn(ks[10], ks[11], ks[12], ks[13])
    g3, be3, m3, v3 = bn(ks[14], ks[15], ks[16], ks[17])

    wm1 = jax.random.normal(ks[18], (hid_dim, n_hidden), jnp.float32) / np.sqrt(hid_dim)
    bm1 = 0.1 * jax.random.normal(ks[19], (1, n_hidden), jnp.float32)
    wm2 = jax.random.normal(ks[20], (n_hidden, output_dim), jnp.float32) / np.sqrt(n_hidden)
    bm2 = 0.1 * jax.random.normal(ks[21], (1, output_dim), jnp.float32)

    # --- fold BN (eval: running stats) into conv weight + one additive constant ---
    def fold(w, b, g, be, m, v):
        s = g[0] / jnp.sqrt(v[0] + EPS)
        w_folded = (w * s).reshape(-1).astype(jnp.float32)       # index ci*K + k
        c = (b[0] - m[0]) * s + be[0]
        return w_folded, c

    w1f, c1 = fold(w1, b1, g1, be1, m1, v1)
    w2f, c2 = fold(w2, b2, g2, be2, m2, v2)
    w3f, c3 = fold(w3, b3, g3, be3, m3, v3)

    return dict(
        # raw params (reference path)
        w1_full=w1, b1=b1, g1=g1, beta1=be1, mean1=m1, var1=v1,
        w2_full=w2, b2=b2, g2=g2, beta2=be2, mean2=m2, var2=v2,
        w3_full=w3, b3=b3, g3=g3, beta3=be3, mean3=m3, var3=v3,
        wm1=wm1, bm1=bm1, wm2=wm2, bm2=bm2,
        # folded kernel params
        w1=w1f, w2=w2f, w3=w3f,
        c=jnp.stack([c1, c2, c3]).astype(jnp.float32),
    )


def ref_forward(x, params, hid_dim):
    """Pure-JAX reference matching PyTorch eval-mode forward (unfolded BN)."""
    def conv1d_valid(h, w, b):
        y = lax.conv_general_dilated(h, w, window_strides=(1,), padding='VALID',
                                     dimension_numbers=('NCH', 'OIH', 'NCH'))
        return y + b.reshape(1, -1, 1)

    h = x
    for i in (1, 2, 3):
        w, b = params[f'w{i}_full'], params[f'b{i}']
        g, be = params[f'g{i}'], params[f'beta{i}']
        m, v = params[f'mean{i}'], params[f'var{i}']
        h = conv1d_valid(h, w, b)
        h = (h - m.reshape(1, -1, 1)) * (g / jnp.sqrt(v + EPS)).reshape(1, -1, 1) \
            + be.reshape(1, -1, 1)                      # BatchNorm1d eval
        h = jnp.maximum(h, 0.0)                         # ReLU (Dropout = identity at eval)
    L3 = h.shape[-1]
    P = adaptive_avg_pool1d_matrix(L3, hid_dim)
    pooled = jnp.einsum('bcl,lh->bch', h, P)[:, 0, :]   # AdaptiveAvgPool1d + squeeze(1)
    z = jnp.maximum(pooled @ params['wm1'] + params['bm1'], 0.0)
    return z @ params['wm2'] + params['bm2']


if __name__ == "__main__":
    key = jax.random.PRNGKey(0)
    kx, kx2, kp = jax.random.split(key, 3)
    B, Cin, L = 2, 4, 32
    hid_dim, n_hidden, out_dim = 10, 50, 1

    params = init_params(kp, Cin, hid_dim, n_hidden, out_dim)

    # small batch (single grid step, padded to one sublane tile)
    x = jax.random.normal(kx, (B, Cin, L), jnp.float32)
    out = jax.block_until_ready(gcnn_forward(x, params, hid_dim))
    ref = ref_forward(x, params, hid_dim)
    assert out.shape == (B, out_dim)
    np.testing.assert_allclose(np.asarray(out), np.asarray(ref), rtol=1e-3, atol=1e-3)

    # larger batch exercising the batch grid (TB=8 -> 3 grid steps with padding)
    B2 = 20
    x2 = jax.random.normal(kx2, (B2, Cin, L), jnp.float32)
    out2 = jax.block_until_ready(gcnn_forward(x2, params, hid_dim, block_b=8))
    ref2 = ref_forward(x2, params, hid_dim)
    assert out2.shape == (B2, out_dim)
    np.testing.assert_allclose(np.asarray(out2), np.asarray(ref2), rtol=1e-3, atol=1e-3)

    print("KERNEL_OK")
</pallas_src>

<mosaic_0001>
module attributes {stable_mosaic.version = 11 : i64} {
  func.func @gcnn_kernel(%arg0: i32, %arg1: memref<3xf32, #tpu.memory_space<smem>>, %arg2: memref<12xf32, #tpu.memory_space<smem>>, %arg3: memref<3xf32, #tpu.memory_space<smem>>, %arg4: memref<3xf32, #tpu.memory_space<smem>>, %arg5: memref<4x8x32xf32, #tpu.memory_space<vmem>>, %arg6: memref<26x50xf32, #tpu.memory_space<vmem>>, %arg7: memref<1x50xf32, #tpu.memory_space<vmem>>, %arg8: memref<50x1xf32, #tpu.memory_space<vmem>>, %arg9: memref<1x1xf32, #tpu.memory_space<vmem>>, %arg10: memref<8x1xf32, #tpu.memory_space<vmem>>) attributes {dimension_semantics = [#tpu.dimension_semantics<parallel>], iteration_bounds = array<i64: 1>, scalar_prefetch = 4 : i64, scratch_operands = 0 : i64, tpu.core_type = #tpu.core_type<tc>, window_params = [{transform_indices = @transform_0, window_bounds = array<i64: 4, 8, 32>}, {pipeline_mode = #tpu.pipeline_mode<synchronous>, transform_indices = @transform_1, window_bounds = array<i64: 26, 50>}, {pipeline_mode = #tpu.pipeline_mode<synchronous>, transform_indices = @transform_2, window_bounds = array<i64: 1, 50>}, {pipeline_mode = #tpu.pipeline_mode<synchronous>, transform_indices = @transform_3, window_bounds = array<i64: 50, 1>}, {pipeline_mode = #tpu.pipeline_mode<synchronous>, transform_indices = @transform_4, window_bounds = array<i64: 1, 1>}, {transform_indices = @transform_5, window_bounds = array<i64: 8, 1>}]} {
    %c0 = arith.constant 0 : index
    %c0_0 = arith.constant 0 : index
    %c0_1 = arith.constant 0 : index
    %0 = vector.load %arg5[%c0, %c0_0, %c0_1] : memref<4x8x32xf32, #tpu.memory_space<vmem>>, vector<1x8x32xf32>
    %1 = vector.shape_cast %0 : vector<1x8x32xf32> to vector<8x32xf32>
    %c0_2 = arith.constant 0 : index
    %2 = memref.load %arg2[%c0_2] : memref<12xf32, #tpu.memory_space<smem>>
    %3 = vector.extract_strided_slice %1 {offsets = [0, 0], sizes = [8, 30], strides = [1, 1]} : vector<8x32xf32> to vector<8x30xf32>
    %4 = vector.broadcast %2 : f32 to vector<8x30xf32>
    %5 = arith.mulf %4, %3 : vector<8x30xf32>
    %c1 = arith.constant 1 : index
    %6 = memref.load %arg2[%c1] : memref<12xf32, #tpu.memory_space<smem>>
    %7 = vector.extract_strided_slice %1 {offsets = [0, 1], sizes = [8, 30], strides = [1, 1]} : vector<8x32xf32> to vector<8x30xf32>
    %8 = vector.broadcast %6 : f32 to vector<8x30xf32>
    %9 = arith.mulf %8, %7 : vector<8x30xf32>
    %c2 = arith.constant 2 : index
    %10 = memref.load %arg2[%c2] : memref<12xf32, #tpu.memory_space<smem>>
    %11 = vector.extract_strided_slice %1 {offsets = [0, 2], sizes = [8, 30], strides = [1, 1]} : vector<8x32xf32> to vector<8x30xf32>
    %12 = vector.broadcast %10 : f32 to vector<8x30xf32>
    %13 = arith.mulf %12, %11 : vector<8x30xf32>
    %c1_3 = arith.constant 1 : index
    %c0_4 = arith.constant 0 : index
    %c0_5 = arith.constant 0 : index
    %14 = vector.load %arg5[%c1_3, %c0_4, %c0_5] : memref<4x8x32xf32, #tpu.memory_space<vmem>>, vector<1x8x32xf32>
    %15 = vector.shape_cast %14 : vector<1x8x32xf32> to vector<8x32xf32>
    %c3 = arith.constant 3 : index
    %16 = memref.load %arg2[%c3] : memref<12xf32, #tpu.memory_space<smem>>
    %17 = vector.extract_strided_slice %15 {offsets = [0, 0], sizes = [8, 30], strides = [1, 1]} : vector<8x32xf32> to vector<8x30xf32>
    %18 = vector.broadcast %16 : f32 to vector<8x30xf32>
    %19 = arith.mulf %18, %17 : vector<8x30xf32>
    %c4 = arith.constant 4 : index
    %20 = memref.load %arg2[%c4] : memref<12xf32, #tpu.memory_space<smem>>
    %21 = vector.extract_strided_slice %15 {offsets = [0, 1], sizes = [8, 30], strides = [1, 1]} : vector<8x32xf32> to vector<8x30xf32>
    %22 = vector.broadcast %20 : f32 to vector<8x30xf32>
    %23 = arith.mulf %22, %21 : vector<8x30xf32>
    %c5 = arith.constant 5 : index
    %24 = memref.load %arg2[%c5] : memref<12xf32, #tpu.memory_space<smem>>
    %25 = vector.extract_strided_slice %15 {offsets = [0, 2], sizes = [8, 30], strides = [1, 1]} : vector<8x32xf32> to vector<8x30xf32>
    %26 = vector.broadcast %24 : f32 to vector<8x30xf32>
    %27 = arith.mulf %26, %25 : vector<8x30xf32>
    %c2_6 = arith.constant 2 : index
    %c0_7 = arith.constant 0 : index
    %c0_8 = arith.constant 0 : index
    %28 = vector.load %arg5[%c2_6, %c0_7, %c0_8] : memref<4x8x32xf32, #tpu.memory_space<vmem>>, vector<1x8x32xf32>
    %29 = vector.shape_cast %28 : vector<1x8x32xf32> to vector<8x32xf32>
    %c6 = arith.constant 6 : index
    %30 = memref.load %arg2[%c6] : memref<12xf32, #tpu.memory_space<smem>>
    %31 = vector.extract_strided_slice %29 {offsets = [0, 0], sizes = [8, 30], strides = [1, 1]} : vector<8x32xf32> to vector<8x30xf32>
    %32 = vector.broadcast %30 : f32 to vector<8x30xf32>
    %33 = arith.mulf %32, %31 : vector<8x30xf32>
    %c7 = arith.constant 7 : index
    %34 = memref.load %arg2[%c7] : memref<12xf32, #tpu.memory_space<smem>>
    %35 = vector.extract_strided_slice %29 {offsets = [0, 1], sizes = [8, 30], strides = [1, 1]} : vector<8x32xf32> to vector<8x30xf32>
    %36 = vector.broadcast %34 : f32 to vector<8x30xf32>
    %37 = arith.mulf %36, %35 : vector<8x30xf32>
    %c8 = arith.constant 8 : index
    %38 = memref.load %arg2[%c8] : memref<12xf32, #tpu.memory_space<smem>>
    %39 = vector.extract_strided_slice %29 {offsets = [0, 2], sizes = [8, 30], strides = [1, 1]} : vector<8x32xf32> to vector<8x30xf32>
    %40 = vector.broadcast %38 : f32 to vector<8x30xf32>
    %41 = arith.mulf %40, %39 : vector<8x30xf32>
    %c3_9 = arith.constant 3 : index
    %c0_10 = arith.constant 0 : index
    %c0_11 = arith.constant 0 : index
    %42 = vector.load %arg5[%c3_9, %c0_10, %c0_11] : memref<4x8x32xf32, #tpu.memory_space<vmem>>, vector<1x8x32xf32>
    %43 = vector.shape_cast %42 : vector<1x8x32xf32> to vector<8x32xf32>
    %c9 = arith.constant 9 : index
    %44 = memref.load %arg2[%c9] : memref<12xf32, #tpu.memory_space<smem>>
    %45 = vector.extract_strided_slice %43 {offsets = [0, 0], sizes = [8, 30], strides = [1, 1]} : vector<8x32xf32> to vector<8x30xf32>
    %46 = vector.broadcast %44 : f32 to vector<8x30xf32>
    %47 = arith.mulf %46, %45 : vector<8x30xf32>
    %c10 = arith.constant 10 : index
    %48 = memref.load %arg2[%c10] : memref<12xf32, #tpu.memory_space<smem>>
    %49 = vector.extract_strided_slice %43 {offsets = [0, 1], sizes = [8, 30], strides = [1, 1]} : vector<8x32xf32> to vector<8x30xf32>
    %50 = vector.broadcast %48 : f32 to vector<8x30xf32>
    %51 = arith.mulf %50, %49 : vector<8x30xf32>
    %c11 = arith.constant 11 : index
    %52 = memref.load %arg2[%c11] : memref<12xf32, #tpu.memory_space<smem>>
    %53 = vector.extract_strided_slice %43 {offsets = [0, 2], sizes = [8, 30], strides = [1, 1]} : vector<8x32xf32> to vector<8x30xf32>
    %54 = vector.broadcast %52 : f32 to vector<8x30xf32>
    %55 = arith.mulf %54, %53 : vector<8x30xf32>
    %56 = arith.addf %5, %9 : vector<8x30xf32>
    %57 = arith.addf %13, %19 : vector<8x30xf32>
    %58 = arith.addf %23, %27 : vector<8x30xf32>
    %59 = arith.addf %33, %37 : vector<8x30xf32>
    %60 = arith.addf %41, %47 : vector<8x30xf32>
    %61 = arith.addf %51, %55 : vector<8x30xf32>
    %62 = arith.addf %56, %57 : vector<8x30xf32>
    %63 = arith.addf %58, %59 : vector<8x30xf32>
    %64 = arith.addf %60, %61 : vector<8x30xf32>
    %65 = arith.addf %62, %63 : vector<8x30xf32>
    %66 = arith.addf %65, %64 : vector<8x30xf32>
    %c0_12 = arith.constant 0 : index
    %67 = memref.load %arg1[%c0_12] : memref<3xf32, #tpu.memory_space<smem>>
    %68 = vector.broadcast %67 : f32 to vector<8x30xf32>
    %69 = arith.addf %66, %68 : vector<8x30xf32>
    %cst = arith.constant 0.000000e+00 : f32
    %70 = vector.broadcast %cst : f32 to vector<8x30xf32>
    %71 = arith.maximumf %69, %70 : vector<8x30xf32>
    %c0_13 = arith.constant 0 : index
    %72 = memref.load %arg3[%c0_13] : memref<3xf32, #tpu.memory_space<smem>>
    %73 = vector.extract_strided_slice %71 {offsets = [0, 0], sizes = [8, 28], strides = [1, 1]} : vector<8x30xf32> to vector<8x28xf32>
    %74 = vector.broadcast %72 : f32 to vector<8x28xf32>
    %75 = arith.mulf %74, %73 : vector<8x28xf32>
    %c1_14 = arith.constant 1 : index
    %76 = memref.load %arg3[%c1_14] : memref<3xf32, #tpu.memory_space<smem>>
    %77 = vector.extract_strided_slice %71 {offsets = [0, 1], sizes = [8, 28], strides = [1, 1]} : vector<8x30xf32> to vector<8x28xf32>
    %78 = vector.broadcast %76 : f32 to vector<8x28xf32>
    %79 = arith.mulf %78, %77 : vector<8x28xf32>
    %c2_15 = arith.constant 2 : index
    %80 = memref.load %arg3[%c2_15] : memref<3xf32, #tpu.memory_space<smem>>
    %81 = vector.extract_strided_slice %71 {offsets = [0, 2], sizes = [8, 28], strides = [1, 1]} : vector<8x30xf32> to vector<8x28xf32>
    %82 = vector.broadcast %80 : f32 to vector<8x28xf32>
    %83 = arith.mulf %82, %81 : vector<8x28xf32>
    %84 = arith.addf %75, %79 : vector<8x28xf32>
    %85 = arith.addf %84, %83 : vector<8x28xf32>
    %c1_16 = arith.constant 1 : index
    %86 = memref.load %arg1[%c1_16] : memref<3xf32, #tpu.memory_space<smem>>
    %87 = vector.broadcast %86 : f32 to vector<8x28xf32>
    %88 = arith.addf %85, %87 : vector<8x28xf32>
    %cst_17 = arith.constant 0.000000e+00 : f32
    %89 = vector.broadcast %cst_17 : f32 to vector<8x28xf32>
    %90 = arith.maximumf %88, %89 : vector<8x28xf32>
    %c0_18 = arith.constant 0 : index
    %91 = memref.load %arg4[%c0_18] : memref<3xf32, #tpu.memory_space<smem>>
    %92 = vector.extract_strided_slice %90 {offsets = [0, 0], sizes = [8, 26], strides = [1, 1]} : vector<8x28xf32> to vector<8x26xf32>
    %93 = vector.broadcast %91 : f32 to vector<8x26xf32>
    %94 = arith.mulf %93, %92 : vector<8x26xf32>
    %c1_19 = arith.constant 1 : index
    %95 = memref.load %arg4[%c1_19] : memref<3xf32, #tpu.memory_space<smem>>
    %96 = vector.extract_strided_slice %90 {offsets = [0, 1], sizes = [8, 26], strides = [1, 1]} : vector<8x28xf32> to vector<8x26xf32>
    %97 = vector.broadcast %95 : f32 to vector<8x26xf32>
    %98 = arith.mulf %97, %96 : vector<8x26xf32>
    %c2_20 = arith.constant 2 : index
    %99 = memref.load %arg4[%c2_20] : memref<3xf32, #tpu.memory_space<smem>>
    %100 = vector.extract_strided_slice %90 {offsets = [0, 2], sizes = [8, 26], strides = [1, 1]} : vector<8x28xf32> to vector<8x26xf32>
    %101 = vector.broadcast %99 : f32 to vector<8x26xf32>
    %102 = arith.mulf %101, %100 : vector<8x26xf32>
    %103 = arith.addf %94, %98 : vector<8x26xf32>
    %104 = arith.addf %103, %102 : vector<8x26xf32>
    %c2_21 = arith.constant 2 : index
    %105 = memref.load %arg1[%c2_21] : memref<3xf32, #tpu.memory_space<smem>>
    %106 = vector.broadcast %105 : f32 to vector<8x26xf32>
    %107 = arith.addf %104, %106 : vector<8x26xf32>
    %cst_22 = arith.constant 0.000000e+00 : f32
    %108 = vector.broadcast %cst_22 : f32 to vector<8x26xf32>
    %109 = arith.maximumf %107, %108 : vector<8x26xf32>
    %c0_23 = arith.constant 0 : index
    %c0_24 = arith.constant 0 : index
    %110 = vector.load %arg6[%c0_23, %c0_24] : memref<26x50xf32, #tpu.memory_space<vmem>>, vector<26x50xf32>
    %cst_25 = arith.constant dense<0.000000e+00> : vector<8x50xf32>
    %111 = tpu.matmul %109, %110, %cst_25 {dimension_numbers = #tpu.dot_dimension_numbers<[1], [0], [0], [1], [0, 0, 1, 1], [], []>} : vector<8x26xf32>, vector<26x50xf32>, vector<8x50xf32> -> vector<8x50xf32>
    %c0_26 = arith.constant 0 : index
    %c0_27 = arith.constant 0 : index
    %112 = vector.load %arg7[%c0_26, %c0_27] : memref<1x50xf32, #tpu.memory_space<vmem>>, vector<1x50xf32>
    %113 = vector.broadcast %112 : vector<1x50xf32> to vector<8x50xf32>
    %114 = arith.addf %111, %113 : vector<8x50xf32>
    %cst_28 = arith.constant 0.000000e+00 : f32
    %115 = vector.broadcast %cst_28 : f32 to vector<8x50xf32>
    %116 = arith.maximumf %114, %115 : vector<8x50xf32>
    %c0_29 = arith.constant 0 : index
    %c0_30 = arith.constant 0 : index
    %117 = vector.load %arg8[%c0_29, %c0_30] : memref<50x1xf32, #tpu.memory_space<vmem>>, vector<50x1xf32>
    %cst_31 = arith.constant dense<0.000000e+00> : vector<8x1xf32>
    %118 = tpu.matmul %116, %117, %cst_31 {dimension_numbers = #tpu.dot_dimension_numbers<[1], [0], [0], [1], [0, 0, 1, 1], [], []>} : vector<8x50xf32>, vector<50x1xf32>, vector<8x1xf32> -> vector<8x1xf32>
    %c0_32 = arith.constant 0 : index
    %c0_33 = arith.constant 0 : index
    %119 = vector.load %arg9[%c0_32, %c0_33] : memref<1x1xf32, #tpu.memory_space<vmem>>, vector<1x1xf32>
    %120 = vector.broadcast %119 : vector<1x1xf32> to vector<8x1xf32>
    %121 = arith.addf %118, %120 : vector<8x1xf32>
    %c0_34 = arith.constant 0 : index
    %c0_35 = arith.constant 0 : index
    %122 = vector.load %arg10[%c0_34, %c0_35] : memref<8x1xf32, #tpu.memory_space<vmem>>, vector<8x1xf32>
    tpu.vector_store %arg10[%c0_34, %c0_35], %121 {strides = array<i32>} : memref<8x1xf32, #tpu.memory_space<vmem>>, vector<8x1xf32>,
    return
  }
  func.func @transform_0(%arg0: i32, %arg1: memref<3xf32, #tpu.memory_space<smem>>, %arg2: memref<12xf32, #tpu.memory_space<smem>>, %arg3: memref<3xf32, #tpu.memory_space<smem>>, %arg4: memref<3xf32, #tpu.memory_space<smem>>) -> (i32, i32, i32) {
    %c0_i32 = arith.constant 0 : i32
    %c0_i32_0 = arith.constant 0 : i32
    %c0_i32_1 = arith.constant 0 : i32
    return %c0_i32, %arg0, %c0_i32_0 : i32, i32, i32
  }
  func.func @transform_1(%arg0: i32, %arg1: memref<3xf32, #tpu.memory_space<smem>>, %arg2: memref<12xf32, #tpu.memory_space<smem>>, %arg3: memref<3xf32, #tpu.memory_space<smem>>, %arg4: memref<3xf32, #tpu.memory_space<smem>>) -> (i32, i32) {
    %c0_i32 = arith.constant 0 : i32
    %c0_i32_0 = arith.constant 0 : i32
    %c0_i32_1 = arith.constant 0 : i32
    return %c0_i32, %c0_i32_0 : i32, i32
  }
  func.func @transform_2(%arg0: i32, %arg1: memref<3xf32, #tpu.memory_space<smem>>, %arg2: memref<12xf32, #tpu.memory_space<smem>>, %arg3: memref<3xf32, #tpu.memory_space<smem>>, %arg4: memref<3xf32, #tpu.memory_space<smem>>) -> (i32, i32) {
    %c0_i32 = arith.constant 0 : i32
    %c0_i32_0 = arith.constant 0 : i32
    %c0_i32_1 = arith.constant 0 : i32
    return %c0_i32, %c0_i32_0 : i32, i32
  }
  func.func @transform_3(%arg0: i32, %arg1: memref<3xf32, #tpu.memory_space<smem>>, %arg2: memref<12xf32, #tpu.memory_space<smem>>, %arg3: memref<3xf32, #tpu.memory_space<smem>>, %arg4: memref<3xf32, #tpu.memory_space<smem>>) -> (i32, i32) {
    %c0_i32 = arith.constant 0 : i32
    %c0_i32_0 = arith.constant 0 : i32
    %c0_i32_1 = arith.constant 0 : i32
    return %c0_i32, %c0_i32_0 : i32, i32
  }
  func.func @transform_4(%arg0: i32, %arg1: memref<3xf32, #tpu.memory_space<smem>>, %arg2: memref<12xf32, #tpu.memory_space<smem>>, %arg3: memref<3xf32, #tpu.memory_space<smem>>, %arg4: memref<3xf32, #tpu.memory_space<smem>>) -> (i32, i32) {
    %c0_i32 = arith.constant 0 : i32
    %c0_i32_0 = arith.constant 0 : i32
    %c0_i32_1 = arith.constant 0 : i32
    return %c0_i32, %c0_i32_0 : i32, i32
  }
  func.func @transform_5(%arg0: i32, %arg1: memref<3xf32, #tpu.memory_space<smem>>, %arg2: memref<12xf32, #tpu.memory_space<smem>>, %arg3: memref<3xf32, #tpu.memory_space<smem>>, %arg4: memref<3xf32, #tpu.memory_space<smem>>) -> (i32, i32) {
    %c0_i32 = arith.constant 0 : i32
    %c0_i32_0 = arith.constant 0 : i32
    return %arg0, %c0_i32 : i32, i32
  }
}

</mosaic_0001>

<bundles_post_ra>
// kernel: tpu_custom_call.1
= control target key start
LH: loop header
LB: loop body
LE: loop exit
PB: predicated region body
PF: predicated region fallthrough
CT: control target
= control target key end

     0   :  { %s919_s0 = inlined_call_operand.hbm [shape: f32[3], index: 0, kind: input, shape index: {}]   ;;  %s920_s4 = inlined_call_operand.hbm [shape: f32[4,8,32], index: 4, kind: input, shape index: {}]   ;;  %s921_s5 = inlined_call_operand.hbm [shape: f32[26,50], index: 5, kind: input, shape index: {}]   ;;  %s922_s6 = inlined_call_operand.hbm [shape: f32[1,50], index: 6, kind: input, shape index: {}]   ;;  %s923_s7 = inlined_call_operand.hbm [shape: f32[50,1], index: 7, kind: input, shape index: {}]   ;;  %s924_s9 = inlined_call_operand.hbm [shape: f32[8,1], index: 9, kind: output, shape index: {}]   ;;  %s925_s1 = inlined_call_operand.hbm [shape: f32[12], index: 1, kind: input, shape index: {}]   ;;  %s926_s8 = inlined_call_operand.<no memory space> [shape: f32[1,1], index: 8, kind: input, shape index: {}]   ;;  %s927_s2 = inlined_call_operand.hbm [shape: f32[3], index: 2, kind: input, shape index: {}]   ;;  %s928_s3 = inlined_call_operand.hbm [shape: f32[3], index: 3, kind: input, shape index: {}]  }
   0x1   :  { %s537_s11 = scalar_lea.hbm %s919_s0, 16 }
   0x2   :  { %p538_p0 = scmp.ne.s32.totalorder %s919_s0, %s537_s11  ;;  %p541_p1 = scmp.lt.u32.totalorder %s537_s11, %s919_s0 }
   0x4   :  { %p543_p2 = pnand %p541_p1, %p538_p0 }
   0x6   :  { %546 = shalt.err (!%p543_p2)  }
   0x7   :  { %s697_s16 = smov [#allocation3]   ;;  %v22_v0 = vstv %s926_s8  ;;  %s547_s23 = scalar_lea.hbm %s925_s1, 16 }
   0x8   :  { %15 = dma.hbm_to_smem %s919_s0, 16, %s697_s16, [#allocation2] }
   0x9   :  { %p548_p3 = scmp.ne.s32.totalorder %s925_s1, %s547_s23  ;;  %p551_p4 = scmp.lt.u32.totalorder %s547_s23, %s925_s1 }
   0xb   :  { %p553_p5 = pnand %p551_p4, %p548_p3 }
   0xd   :  { %556 = shalt.err (!%p553_p5)  }
   0xe   :  { %s698_s28 = smov [#allocation4]   ;;  %23 = vst [vmem:[#allocation7] sm:$0x1] %v22_v0  ;;  %s557_s10 = scalar_lea.hbm %s927_s2, 16 }
   0xf   :  { %17 = dma.hbm_to_smem %s925_s1, 16, %s698_s28, [#allocation2] }
  0x10   :  { %p558_p6 = scmp.ne.s32.totalorder %s927_s2, %s557_s10  ;;  %p561_p7 = scmp.lt.u32.totalorder %s557_s10, %s927_s2 }
  0x12   :  { %p563_p8 = pnand %p561_p7, %p558_p6 }
  0x14   :  { %566 = shalt.err (!%p563_p8)  }
  0x15   :  { %s699_s15 = smov [#allocation5]   ;;  %s567_s19 = scalar_lea.hbm %s928_s3, 16 }
  0x16   :  { %19 = dma.hbm_to_smem %s927_s2, 16, %s699_s15, [#allocation2] }
  0x17   :  { %p568_p9 = scmp.ne.s32.totalorder %s928_s3, %s567_s19  ;;  %p571_p10 = scmp.lt.u32.totalorder %s567_s19, %s928_s3 }
  0x19   :  { %p573_p11 = pnand %p571_p10, %p568_p9 }
  0x1b   :  { %576 = shalt.err (!%p573_p11)  }
  0x1c   :  { %s700_s24 = smov [#allocation6]  }
  0x1d   :  { %21 = dma.hbm_to_smem %s928_s3, 16, %s700_s24, [#allocation2] }
  0x1e   :  { %687 = dma.done.wait [#allocation2], 64 }
  0x1f   :  { %688 = vsyncadd [#allocation2], 4294967232 }
  0x20   :  { %25 = sfence }
  0x21   :  { %26 = vsyncpa [#allocation9], 0 }
  0x22   :  { %27 = vsyncpa [#allocation12], 0 }
  0x23   :  { %28 = vsyncpa [#allocation15], 0 }
  0x24   :  { %29 = vsyncpa [#allocation10], 0  ;;  %s701_s2 = smov [#allocation11]   ;;  %s702_s28 = smov [#allocation8]  }
  0x25   :  { %s47_s27 = sshll.u32 %s701_s2, 4  ;;  %s35_s0 = sshll.u32 %s702_s28, 4  ;;  %s48_s27 = int_to_ptr.vmem [resolvable:$true] %s47_s27  ;;  %s817_s0 = int_to_ptr.vmem [resolvable:$true] %s35_s0 }
  0x26   :  { %s577_s30 = scalar_lea.hbm %s921_s5, 512 }
  0x27   :  { %p578_p12 = scmp.ne.s32.totalorder %s921_s5, %s577_s30  ;;  %p581_p13 = scmp.lt.u32.totalorder %s577_s30, %s921_s5 }
  0x29   :  { %p583_p0 = pnand %p581_p13, %p578_p12 }
  0x2b   :  { %586 = shalt.err (!%p583_p0)
}
  0x2c   :  { %s587_s13 = scalar_lea.vmem %s48_s27, 512  ;;  %p592_p2 = scmp.lt.s32.totalorder %s48_s27, %s48_s27 }
  0x2d   :  { %p588_p1 = scmp.ne.s32.totalorder %s48_s27, %s587_s13  ;;  %p593_p3 = scmp.lt.s32.totalorder %s587_s13, %s587_s13 }
  0x2f   :  { %p594_p4 = por %p593_p3, %p592_p2 }
  0x31   :  { %p595_p5 = pnand %p594_p4, %p588_p1 }
  0x33   :  { %598 = shalt.err (!%p595_p5)
}
  0x34   :  { %s703_s14 = smov 128   ;;  %s704_s15 = smov 8  }
  0x35   :  { %53 = dma.hbm_to_vmem [thread:$0]  %s921_s5, 512, %s48_s27, [#allocation12], %s703_s14, %s703_s14, %s704_s15  }
  0x36   :  { %s599_s19 = scalar_lea.hbm %s920_s4, 512 }
  0x37   :  { %p600_p6 = scmp.ne.s32.totalorder %s920_s4, %s599_s19  ;;  %p603_p7 = scmp.lt.u32.totalorder %s599_s19, %s920_s4 }
  0x39   :  { %p605_p8 = pnand %p603_p7, %p600_p6 }
  0x3b   :  { %608 = shalt.err (!%p605_p8)
}
  0x3c   :  { %s609_s24 = scalar_lea.vmem %s817_s0, 512  ;;  %p614_p10 = scmp.lt.s32.totalorder %s817_s0, %s817_s0 }
  0x3d   :  { %p610_p9 = scmp.ne.s32.totalorder %s817_s0, %s609_s24  ;;  %p615_p11 = scmp.lt.s32.totalorder %s609_s24, %s609_s24 }
  0x3f   :  { %p616_p12 = por %p615_p11, %p614_p10 }
  0x41   :  { %p617_p13 = pnand %p616_p12, %p610_p9 }
  0x43   :  { %620 = shalt.err (!%p617_p13)
}
  0x44   :  { %41 = dma.hbm_to_vmem [thread:$0]  %s920_s4, 512, %s817_s0, [#allocation9], %s703_s14, %s703_s14, %s704_s15  }
  0x45   :  { %s705_s26 = smov [#allocation13]   ;;  %s706_s27 = smov [#allocation14]  }
  0x46   :  { %s60_s2 = sshll.u32 %s705_s26, 4  ;;  %s69_s28 = sshll.u32 %s706_s27, 4  ;;  %s61_s2 = int_to_ptr.vmem [resolvable:$true] %s60_s2  ;;  %s854_s28 = int_to_ptr.vmem [resolvable:$true] %s69_s28 }
  0x47   :  { %s621_s30 = scalar_lea.hbm %s922_s6, 16 }
  0x48   :  { %p622_p0 = scmp.ne.s32.totalorder %s922_s6, %s621_s30  ;;  %p625_p1 = scmp.lt.u32.totalorder %s621_s30, %s922_s6 }
  0x4a   :  { %p627_p2 = pnand %p625_p1, %p622_p0 }
  0x4c   :  { %630 = shalt.err (!%p627_p2)
}
  0x4d   :  { %s631_s4 = scalar_lea.vmem %s61_s2, 16  ;;  %s635_s0 = scalar_lea.vmem %s61_s2, 32 }
  0x4e   :  { %p632_p3 = scmp.ne.s32.totalorder %s61_s2, %s631_s4  ;;  %p636_p4 = scmp.lt.s32.totalorder %s61_s2, %s61_s2 }
  0x4f   :  { %p637_p5 = scmp.lt.s32.totalorder %s635_s0, %s631_s4 }
  0x51   :  { %p638_p6 = por %p637_p5, %p636_p4 }
  0x53   :  { %p639_p7 = pnand %p638_p6, %p632_p3 }
  0x55   :  { %642 = shalt.err (!%p639_p7)
}
  0x56   :  { %63 = dma.hbm_to_vmem [thread:$0]  %s922_s6, 16, %s61_s2, [#allocation12]  }
  0x57   :  { %s643_s18 = scalar_lea.hbm %s923_s7, 896 }
  0x58   :  { %p644_p8 = scmp.ne.s32.totalorder %s923_s7, %s643_s18  ;;  %p647_p9 = scmp.lt.u32.totalorder %s643_s18, %s923_s7 }
  0x5a   :  { %p649_p10 = pnand %p647_p9, %p644_p8 }
  0x5c   :  { %652 = shalt.err (!%p649_p10)
}
  0x5d   :  { %s653_s23 = scalar_lea.vmem %s854_s28, 896  ;;  %p658_p12 = scmp.lt.s32.totalorder %s854_s28, %s854_s28 }
  0x5e   :  { %p654_p11 = scmp.ne.s32.totalorder %s854_s28, %s653_s23  ;;  %p659_p13 = scmp.lt.s32.totalorder %s653_s23, %s653_s23 }
  0x60   :  { %p660_p0 = por %p659_p13, %p658_p12 }
  0x62   :  { %p661_p1 = pnand %p660_p0, %p654_p11 }
  0x64   :  { %664 = shalt.err (!%p661_p1)
}
  0x65   :  { %75 = dma.hbm_to_vmem [thread:$0]  %s923_s7, 896, %s854_s28, [#allocation15], %s703_s14, %s703_s14, %s704_s15  }
  0x66   :  { %689 = dma.done.wait [#allocation9], 512  }
  0x67   :  { %690 = vsyncadd [#allocation9], 4294966784 }
  0x68   :  { %691 = dma.done.wait [#allocation12], 528  }
  0x69   :  { %692 = vsyncadd [#allocation12], 4294966768 }
  0x6a   :  { %693 = dma.done.wait [#allocation15], 896  }
  0x6b   :  { %694 = vsyncadd [#allocation15], 4294966400  ;;  %s444_s5 = sld [smem:[#allocation4 + $0x7]]  ;;  %s448_s25 = sld [smem:[#allocation4 + $0xb]]  ;;  %v112_v1 = vld [vmem:[#allocation8 + $0x10] sm:$0xff]  ;;  %v123_v3 = vld [vmem:[#allocation8 + $0x18] sm:$0xff] }
  0x6c   :  { %s440_s26 = sld [smem:[#allocation4 + $0x3]]  ;;  %s442_s2 = sld [smem:[#allocation4 + $0x5]]  ;;  %v101_v5 = vld [vmem:[#allocation8 + $0x8] sm:$0xff]  ;;  %v90_v18 = vld [vmem:[#allocation8] sm:$0xff]  ;;  %v711_v62 = vmov 0.0|0.0   ;;  %vm253_vm0 = vcmask 1041408  }
  0x6d   :  { %s446_s27 = sld [smem:[#allocation4 + $0x9]]  ;;  %s707_s7 = smov 127   ;;  %v238_v59 = vld [vmem:[#allocation11] sm:$0xff]  ;;  %v239_v60 = vld [vmem:[#allocation11 + $0x8] sm:$0xff]  ;;  %502 = vmatprep.subr.bf16.mxu0 %v711_v62  ;;  %509 = vmatprep.subr.bf16.mxu1 %v711_v62  ;;  %vm712_vm1 = vmmov 1   ;;  %vm713_vm3 = vmmov 0  }
  0x6e   :  { %s708_s14 = smov 2   ;;  %s443_s15 = sld [smem:[#allocation4 + $0x6]]  ;;  %v503_v61 = vpack.c.bf16 %v239_v60, %v238_v59  ;;  %vm507_vm2 = vmpackc.low %vm253_vm0, %vm712_vm1  ;;  %vm249_vm4 = vcmask 211968   ;;  %vm342_vm5 = vcmask 408576   ;;  %vm419_vm6 = vcmask 7168  }
  0x6f   :  { %s447_s28 = sld [smem:[#allocation4 + $0xa]]  ;;  %s438_s8 = sld [smem:[#allocation4 + $0x1]] }
  0x70   :  { %s439_s29 = sld [smem:[#allocation4 + $0x2]]  ;;  %s709_s30 = smov 1   ;;  %504 = vmatpush3.bf16.msra.mxu0 %v503_v61 }
  0x71   :  { %v117_v2 = vstv %s444_s5  ;;  %v131_v4 = vstv %s448_s25  ;;  %s710_s10 = smov 126   ;;  %s441_s3 = sld [smem:[#allocation4 + $0x4]]  ;;  %505 = vmatprep.subr.bf16.mxu0 %v711_v62 }
  0x72   :  { %v118_v6 = vmul.f32 %v117_v2, %v112_v1  ;;  %v103_v7 = vstv %s440_s26  ;;  %v109_v8 = vstv %s442_s2  ;;  %v132_v10 = vmul.f32 %v131_v4, %v123_v3  ;;  %s445_s11 = sld [smem:[#allocation4 + $0x8]]  ;;  %s450_s0 = sld [smem:[#allocation5 + $0x2]]  ;;  %v241_v2 = vld [vmem:[#allocation11 + $0x18] sm:$0x3] }
  0x73   :  { %v104_v9 = vmul.f32 %v103_v7, %v101_v5  ;;  %v110_v11 = vmul.f32 %v109_v8, %v101_v5  ;;  %v125_v12 = vstv %s446_s27  ;;  %s91_s12 = sld [smem:[#allocation4]]  ;;  %s449_s13 = sld [smem:[#allocation5 + $0x1]] }
  0x74   :  { %149 = vrot.lane.b32.xlu0 %v118_v6, %s707_s7  ;;  %v126_v13 = vmul.f32 %v125_v12, %v123_v3  ;;  %v114_v14 = vstv %s443_s15  ;;  %s188_s4 = sld [smem:[#allocation3]]  ;;  %s451_s17 = sld [smem:[#allocation3 + $0x1]]  ;;  %v328_v12 = vld [vmem:[#allocation14] sm:$0xff] }
  0x75   :  { %139 = vrot.lane.b32.xlu1 %v104_v9, %s708_s14  ;;  %v115_v15 = vmul.f32 %v114_v14, %v112_v1  ;;  %v128_v16 = vstv %s447_s28  ;;  %v95_v20 = vstv %s438_s8  ;;  %s192_s16 = sld [smem:[#allocation5]]  ;;  %s897_s1 = sld [smem:[#allocation6 + $0x2]]  ;;  %v714_v9 = vmov 0.0   ;;  %v330_v14 = vld [vmem:[#allocation14 + $0x10] sm:$0xff] }
  0x76   :  { %v98_v19 = vstv %s439_s29  ;;  %v129_v22 = vmul.f32 %v128_v16, %v123_v3  ;;  %v96_v24 = vmul.f32 %v95_v20, %v90_v18  ;;  %s899_s18 = sld [smem:[#allocation6 + $0x1]]  ;;  %482 = vmatprep.mubr.msk.f32.mxu0 %vm713_vm3, %v714_v9  ;;  %499 = vmatprep.mubr.msk.f32.mxu1 %vm713_vm3, %v714_v9  ;;  %s215_s19 = sld [smem:[#allocation6]] }
  0x77   :  { %v99_v23 = vmul.f32 %v98_v19, %v90_v18  ;;  %v106_v29 = vstv %s441_s3  ;;  %s454_s20 = sld [smem:[#allocation3 + $0x2]]  ;;  %s715_s21 = smov [#allocation16]  }
  0x78   :  { %159 = vrot.lane.b32.xlu0 %v132_v10, %s707_s7  ;;  %v107_v30 = vmul.f32 %v106_v29, %v101_v5  ;;  %v120_v32 = vstv %s445_s11  ;;  %v199_v53 = vstv %s450_s0  ;;  %s427_s22 = sshll.u32 %s715_s21, 4  ;;  %s428_s22 = int_to_ptr.vmem [resolvable:$true] %s427_s22 }
  0x79   :  { %144 = vrot.lane.b32.xlu1 %v110_v11, %s707_s7  ;;  %v121_v35 = vmul.f32 %v120_v32, %v112_v1  ;;  %v92_v41 = vstv %s91_s12  ;;  %v196_v54 = vstv %s449_s13  ;;  %v240_v1 = vld [vmem:[#allocation11 + $0x10] sm:$0xff]  ;;  %s665_s23 = scalar_lea.vmem %s428_s22, 128  ;;  %p670_p3 = scmp.lt.s32.totalorder %s428_s22, %s428_s22 }
  0x7a   :  { %v93_v42 = vmul.f32 %v92_v41, %v90_v18  ;;  %v189_v49 = vstv %s188_s4  ;;  %v506_v4 = vpack.c.bf16 %v241_v2, %v240_v1  ;;  %v212_v6 = vstv %s451_s17  ;;  %p666_p2 = scmp.ne.s32.totalorder %s428_s22, %s665_s23  ;;  %p671_p4 = scmp.lt.s32.totalorder %s665_s23, %s665_s23 }
  0x7b   :  { %v193_v58 = vstv %s192_s16  ;;  %v222_v10 = vstv %s897_s1 }
  0x7c   :  { %154 = vrot.lane.b32.xlu0 %v126_v13, %s708_s14  ;;  %508 = vmatpush3.bf16.msk.msra.mxu0 %vm507_vm2, %v506_v4  ;;  %v219_v11 = vstv %s899_s18  ;;  %v329_v13 = vld [vmem:[#allocation14 + $0x8] sm:$0xff]  ;;  %p672_p5 = por %p671_p4, %p670_p3 }
  0x7d   :  { %v510_v16 = vpack.c.bf16 %v329_v13, %v328_v12 }
  0x7e   :  { %p673_p6 = pnand %p672_p5, %p666_p2 }
  0x7f   :  { %511 = vmatpush3.bf16.msra.mxu1 %v510_v16 }
  0x80   :  { %512 = vmatprep.subr.bf16.mxu1 %v711_v62 }
  0xe6   :  { %v150_v17 = vpop.permute.xlu0 %149 }
  0xe7   :  { %v152_v21 = vadd.f32 %v150_v17, %v115_v15  ;;  %v140_v27 = vpop.permute.xlu1 %139  ;;  %v331_v17 = vld [vmem:[#allocation14 + $0x18] sm:$0xff] }
  0xe8   :  { %v142_v28 = vadd.f32 %v140_v27, %v99_v23  ;;  %v513_v20 = vpack.c.bf16 %v331_v17, %v330_v14 }
  0xe9   :  { %169 = vrot.lane.b32.xlu1 %v152_v21, %s709_s30  ;;  %v216_v21 = vstv %s215_s19 }
  0xea   :  { %v160_v25 = vpop.permute.xlu0 %159  ;;  %514 = vmatpush3.bf16.msra.mxu1 %v513_v20 }
  0xeb   :  { %v162_v26 = vadd.f32 %v160_v25, %v129_v22  ;;  %v145_v31 = vpop.permute.xlu1 %144  ;;  %515 = vmatprep.subr.bf16.mxu1 %v711_v62 }
  0xec   :  { %v147_v33 = vadd.f32 %v145_v31, %v107_v30  ;;  %v332_v30 = vld [vmem:[#allocation14 + $0x20] sm:$0xff]  ;;  %v333_v31 = vld [vmem:[#allocation14 + $0x28] sm:$0xff] }
  0xed   :  { %174 = vrot.lane.b32.xlu0 %v162_v26, %s709_s30  ;;  %134 = vrot.lane.b32.xlu1 %v96_v24, %s707_s7  ;;  %v235_v26 = vstv %s454_s20  ;;  %v516_v32 = vpack.c.bf16 %v333_v31, %v332_v30 }
  0xee   :  { %v155_v34 = vpop.permute.xlu0 %154 }
  0xef   :  { %v157_v38 = vadd.f32 %v155_v34, %v121_v35  ;;  %517 = vmatpush3.bf16.msra.mxu1 %v516_v32  ;;  %v455_v34 = vld [vmem:[#allocation13] ss:$0 sm:$0xff] }
  0xf0   :  { %497 = vmatprep.subr.mxu1 %v714_v9 }
  0xf1   :  { %164 = vrot.lane.b32.xlu0 %v142_v28, %s710_s10 }
 0x15b   :  { %v170_v36 = vpop.permute.xlu1 %169 }
 0x15c   :  { %v172_v37 = vadd.f32 %v170_v36, %v147_v33  ;;  %v334_v33 = vld [vmem:[#allocation14 + $0x30] sm:$0x3] }
 0x15d   :  { %498 = vmatpush3.msk.msra.mxu1 %vm253_vm0, %v334_v33 }
 0x15e   :  { %179 = vrot.lane.b32.xlu1 %v172_v37, %s707_s7 }
 0x15f   :  { %v175_v39 = vpop.permute.xlu0 %174  ;;  %v135_v43 = vpop.permute.xlu1 %134 }
 0x160   :  { %v177_v40 = vadd.f32 %v175_v39, %v157_v38  ;;  %v137_v44 = vadd.f32 %v135_v43, %v93_v42  ;;  %v458_v39 = vld [vmem:[#allocation7] ss:$0 sm:$0xff] }
 0x162   :  { %184 = vrot.lane.b32.xlu0 %v177_v40, %s710_s10 }
 0x163   :  { %v165_v45 = vpop.permute.xlu0 %164 }
 0x164   :  { %v167_v47 = vadd.f32 %v165_v45, %v137_v44 }
 0x1d0   :  { %v180_v46 = vpop.permute.xlu1 %179 }
 0x1d1   :  { %v182_v48 = vadd.f32 %v180_v46, %v167_v47 }
 0x1d4   :  { %v185_v50 = vpop.permute.xlu0 %184 }
 0x1d5   :  { %v187_v51 = vadd.f32 %v185_v50, %v182_v48 }
 0x1d7   :  { %v190_v52 = vadd.f32 %v189_v49, %v187_v51 }
 0x1d9   :  { %v191_v55 = vmax.f32 %v190_v52, 0.0 }
 0x1db   :  { %v200_v56 = vmul.f32 %v199_v53, %v191_v55  ;;  %v197_v57 = vmul.f32 %v196_v54, %v191_v55  ;;  %v194_v63 = vmul.f32 %v193_v58, %v191_v55 }
 0x1dd   :  { %207 = vrot.lane.b32.xlu0 %v200_v56, %s710_s10  ;;  %202 = vrot.lane.b32.xlu1 %v197_v57, %s707_s7 }
 0x24f   :  { %v203_v0 = vpop.permute.xlu1 %202  ;;  %v208_v5 = vpop.permute.xlu0 %207 }
 0x250   :  { %v205_v3 = vadd.f32 %v203_v0, %v194_v63 }
 0x252   :  { %v210_v7 = vadd.f32 %v208_v5, %v205_v3 }
 0x254   :  { %v213_v8 = vadd.f32 %v212_v6, %v210_v7 }
 0x256   :  { %v214_v15 = vmax.f32 %v213_v8, 0.0 }
 0x258   :  { %v223_v18 = vmul.f32 %v222_v10, %v214_v15  ;;  %v220_v19 = vmul.f32 %v219_v11, %v214_v15  ;;  %v217_v22 = vmul.f32 %v216_v21, %v214_v15 }
 0x25a   :  { %230 = vrot.lane.b32.xlu0 %v223_v18, %s710_s10  ;;  %225 = vrot.lane.b32.xlu1 %v220_v19, %s707_s7 }
 0x2cc   :  { %v226_v23 = vpop.permute.xlu1 %225  ;;  %v231_v25 = vpop.permute.xlu0 %230 }
 0x2cd   :  { %v228_v24 = vadd.f32 %v226_v23, %v217_v22 }
 0x2cf   :  { %v233_v27 = vadd.f32 %v231_v25, %v228_v24 }
 0x2d1   :  { %v236_v28 = vadd.f32 %v235_v26, %v233_v27 }
 0x2d3   :  { %v237_v29 = vmax.f32 %v236_v28, 0.0 }
 0x2d5   :  { %483 = vmatmul.mubr.msk.f32.vlgmr.msra.gmra.mrb[0].mxu0 %vm249_vm4, %v237_v29 }
 0x3a8   :  { %v323_v35 = vpop.f32.mrb[0].mxu0 }
 0x3a9   :  { %v324_v36 = vadd.f32 %v455_v34, %v323_v35  ;;  %v484_v37 = vpop.f32.mrb[1].mxu0 }
 0x3ab   :  { %v327_v38 = vmax.f32 %v324_v36, 0.0 }
 0x3ad   :  { %500 = vmatmul.mubr.msk.f32.vlgmr.msra.gmra.mrb[0].mxu1 %vm342_vm5, %v327_v38 }
 0x480   :  { %v415_v40 = vpop.f32.mrb[0].mxu1 }
 0x481   :  { %v416_v41 = vadd.f32 %v458_v39, %v415_v40  ;;  %v501_v42 = vpop.f32.mrb[1].mxu1 }
 0x483   :  { %420 = vst.msk [vmem:[#allocation16] sm:$0xff] %vm419_vm6, %v416_v41 }
 0x484   :  { %676 = shalt.err (!%p673_p6)
}
 0x485   :  { %s677_s5 = scalar_lea.hbm %s924_s9, 128 }
 0x486   :  { %p678_p7 = scmp.ne.s32.totalorder %s924_s9, %s677_s5  ;;  %p681_p8 = scmp.lt.u32.totalorder %s677_s5, %s924_s9 }
 0x488   :  { %p683_p9 = pnand %p681_p8, %p678_p7 }
 0x48a   :  { %686 = shalt.err (!%p683_p9)
}
 0x48b   :  { %430 = dma.vmem_to_hbm [thread:$0]  %s428_s22, 128, %s924_s9, [#allocation10]  }
 0x48c   :  { %695 = dma.done.wait [#allocation10], 128  }
 0x48d   :  { %696 = vsyncadd [#allocation10], 4294967168 }
 0x48e   :  { %434 = vsyncpa [#allocation9], 1 }
 0x48f   :  { %435 = vsyncpa [#allocation12], 1 }
 0x490   :  { %436 = vsyncpa [#allocation15], 1 }
 0x491   :  { %437 = vsyncpa [#allocation10], 1 }

</bundles_post_ra>
